<compile_context>
chip_gen: v7x
topology: tpu7x:2x2x1
jax: 0.10.0
libtpu: 0.0.40
codegen_flags: <defaults>
</compile_context>

<pallas_src>
import functools

import jax
import jax.numpy as jnp
from jax.experimental import pallas as pl
from jax.experimental.pallas import tpu as pltpu


def _mps_kernel(x_ref, w_ref, o_ref, res_ref, *, output_dim, cores_per_step, a_chunk):
    # x_ref:   (I, B) VMEM        -- x transposed, resident across all grid steps
    # w_ref:   (C, A, I, B) VMEM  -- C MPS cores per grid step, native (a, i, b) layout
    # o_ref:   (A, B)             -- transposed output, written once at the last step
    # res_ref: (A, B) f32 scratch -- running chain result

    if output_dim == 1:
        # Single core: input_dim may differ from bond, contract x^T directly into o_ref.
        a_dim = o_ref.shape[0]
        res0 = x_ref[...].astype(jnp.float32)                       # (I, B)
        for a0 in range(0, a_dim, a_chunk):
            sz = min(a_chunk, a_dim - a0)
            t_chunk = w_ref[0, pl.ds(a0, sz), :, :].astype(jnp.float32)   # fused cast
            o_ref[pl.ds(a0, sz), :] = jnp.sum(
                t_chunk * res0[None, :, :], axis=1).astype(o_ref.dtype)
        return

    a_dim = res_ref.shape[0]
    k = pl.program_id(0)

    # Seed the chain with x^T (valid: chaining requires input_dim == bond_dim).
    @pl.when(k == 0)
    def _():
        res_ref[...] = x_ref[...].astype(jnp.float32)

    def chain_core(c):
        # new[a, b] = sum_i T_c[a, i, b] * res[i, b]
        res = res_ref[...]                                           # (A, B) f32
        for a0 in range(0, a_dim, a_chunk):
            sz = min(a_chunk, a_dim - a0)
            # Per-chunk load + cast: never materializes a full f32 core.
            t_chunk = w_ref[c, pl.ds(a0, sz), :, :].astype(jnp.float32)   # (sz, I, B)
            res_ref[pl.ds(a0, sz), :] = jnp.sum(t_chunk * res[None, :, :], axis=1)

    rem = output_dim % cores_per_step
    for c in range(cores_per_step):
        if rem == 0 or c < rem:
            # Statically known to be a real core on every grid step: no guard.
            chain_core(c)
        else:
            # Only the ragged tail of the last grid step needs masking.
            @pl.when(k * cores_per_step + c < output_dim)
            def _(c=c):
                chain_core(c)

    @pl.when(k == pl.num_programs(0) - 1)
    def _():
        o_ref[...] = res_ref[...].astype(o_ref.dtype)


def _round_up(v, m):
    return -(-v // m) * m


def _sublane_tile(itemsize):
    # f32 -> 8, bf16 -> 16, int8 -> 32 sublanes per tile.
    return 8 * max(1, 4 // itemsize)


def _padded_tile_bytes(rows, cols, dtype):
    itemsize = jnp.dtype(dtype).itemsize
    return _round_up(rows, _sublane_tile(itemsize)) * _round_up(cols, 128) * itemsize


def mps_layer_forward(x, tensors, *, max_cores_per_step=32,
                      weight_vmem_budget_bytes=40 << 20):
    """x: (batch, input_dim); tensors: (output_dim, bond, input_dim, bond), torch (a,i,b) layout."""
    output_dim, bond, in_dim, bond2 = tensors.shape
    batch, x_in = x.shape
    assert bond == bond2
    assert x_in == in_dim
    assert batch == bond, "einsum 'bi,aib->ba' requires batch == bond_dim"
    if output_dim > 1:
        assert in_dim == bond, "chained contraction requires input_dim == bond_dim"
    if output_dim == 0:
        return x

    # Only the tiny activation gets a layout change outside the kernel.
    x_t = x.T                                                       # (input_dim, batch)

    # --- VMEM budget with real (sublane, 128)-tile padding ---------------------------
    core_padded = bond * _padded_tile_bytes(in_dim, bond, tensors.dtype)   # one (A,I,B) core
    x_block = _padded_tile_bytes(in_dim, batch, x.dtype)
    out_block = _padded_tile_bytes(bond, batch, x.dtype)
    scratch_block = _padded_tile_bytes(bond, batch, jnp.float32)
    fixed = 2 * x_block + 2 * out_block + scratch_block + (2 << 20)        # + headroom

    # Pack as many cores per grid step as the (double-buffered) weight budget allows.
    # Budget kept conservative so the same choice fits v7x's 64 MiB VMEM.
    cores_per_step = int(max(1, min(output_dim, max_cores_per_step,
                                    weight_vmem_budget_bytes // (2 * core_padded))))
    num_steps = pl.cdiv(output_dim, cores_per_step)
    needed = 2 * cores_per_step * core_padded + fixed

    a_chunk = min(bond, 32)                                          # bounds f32 temporary

    kernel = functools.partial(_mps_kernel, output_dim=output_dim,
                               cores_per_step=cores_per_step, a_chunk=a_chunk)

    out_t = pl.pallas_call(
        kernel,
        out_shape=jax.ShapeDtypeStruct((bond, batch), x.dtype),
        grid=(num_steps,),
        in_specs=[
            # x^T stays resident (constant block index across the grid).
            pl.BlockSpec((in_dim, batch), lambda k: (0, 0)),
            # Stream C cores per grid step; auto double-buffered DMA overlaps compute.
            pl.BlockSpec((cores_per_step, bond, in_dim, bond), lambda k: (k, 0, 0, 0)),
        ],
        out_specs=pl.BlockSpec((bond, batch), lambda k: (0, 0)),
        scratch_shapes=[pltpu.VMEM((bond, batch), jnp.float32)],
        compiler_params=pltpu.CompilerParams(
            dimension_semantics=("arbitrary",),                      # chained reduction over cores
            vmem_limit_bytes=int(needed) if needed > (16 << 20) else None,
        ),
    )(x_t, tensors)

    return out_t.T                                                   # (batch, bond)


if __name__ == "__main__":
    # Small shapes consistent with the module's einsum constraints:
    # batch == bond_dim (required by 'bi,aib->ba'); input_dim == bond_dim (required
    # for chaining more than one core).
    input_dim = 8
    bond_dim = 8
    output_dim = 4
    batch = bond_dim

    key = jax.random.PRNGKey(0)
    kx, kw = jax.random.split(key)
    x = jax.random.normal(kx, (batch, input_dim), dtype=jnp.float32)
    # ParameterList of output_dim tensors, each torch.randn(bond, input_dim, bond).
    tensors = jax.random.normal(
        kw, (output_dim, bond_dim, input_dim, bond_dim), dtype=jnp.float32
    )

    out = jax.block_until_ready(mps_layer_forward(x, tensors))

    # Pure-JAX reference mirroring the torch forward loop.
    ref = x
    for k in range(output_dim):
        ref = jnp.einsum("bi,aib->ba", ref, tensors[k])
    assert out.shape == ref.shape
    assert jnp.allclose(out, ref, atol=1e-4, rtol=1e-4), "mismatch vs reference"

    print("KERNEL_OK")
</pallas_src>

<mosaic_0001>
module attributes {stable_mosaic.version = 11 : i64} {
  func.func @_mps_kernel(%arg0: i32, %arg1: memref<8x8xf32, #tpu.memory_space<vmem>>, %arg2: memref<4x8x8x8xf32, #tpu.memory_space<vmem>>, %arg3: memref<8x8xf32, #tpu.memory_space<vmem>>, %arg4: memref<8x8xf32, #tpu.memory_space<vmem>>) attributes {dimension_semantics = [#tpu.dimension_semantics<arbitrary>], iteration_bounds = array<i64: 1>, scalar_prefetch = 0 : i64, scratch_operands = 1 : i64, tpu.core_type = #tpu.core_type<tc>, window_params = [{pipeline_mode = #tpu.pipeline_mode<synchronous>, transform_indices = @transform_0, window_bounds = array<i64: 8, 8>}, {transform_indices = @transform_1, window_bounds = array<i64: 4, 8, 8, 8>}, {pipeline_mode = #tpu.pipeline_mode<synchronous>, transform_indices = @transform_2, window_bounds = array<i64: 8, 8>}]} {
    %c0_i32 = arith.constant 0 : i32
    %0 = arith.cmpi eq, %arg0, %c0_i32 : i32
    %1 = arith.extui %0 : i1 to i32
    %c0_i32_0 = arith.constant 0 : i32
    %2 = arith.cmpi ne, %1, %c0_i32_0 : i32
    scf.if %2 {
      %c0_34 = arith.constant 0 : index
      %c0_35 = arith.constant 0 : index
      %38 = vector.load %arg1[%c0_34, %c0_35] : memref<8x8xf32, #tpu.memory_space<vmem>>, vector<8x8xf32>
      %c0_36 = arith.constant 0 : index
      %c0_37 = arith.constant 0 : index
      %39 = vector.load %arg4[%c0_36, %c0_37] : memref<8x8xf32, #tpu.memory_space<vmem>>, vector<8x8xf32>
      tpu.vector_store %arg4[%c0_36, %c0_37], %38 {strides = array<i32>} : memref<8x8xf32, #tpu.memory_space<vmem>>, vector<8x8xf32>,
    } else {
    }
    %c0 = arith.constant 0 : index
    %c0_1 = arith.constant 0 : index
    %3 = vector.load %arg4[%c0, %c0_1] : memref<8x8xf32, #tpu.memory_space<vmem>>, vector<8x8xf32>
    %c0_2 = arith.constant 0 : index
    %c0_3 = arith.constant 0 : index
    %c0_4 = arith.constant 0 : index
    %c0_5 = arith.constant 0 : index
    %4 = vector.load %arg2[%c0_2, %c0_3, %c0_4, %c0_5] : memref<4x8x8x8xf32, #tpu.memory_space<vmem>>, vector<1x8x8x8xf32>
    %5 = vector.shape_cast %4 : vector<1x8x8x8xf32> to vector<8x8x8xf32>
    %6 = vector.shape_cast %3 : vector<8x8xf32> to vector<1x8x8xf32>
    %7 = vector.broadcast %6 : vector<1x8x8xf32> to vector<8x8x8xf32>
    %8 = arith.mulf %5, %7 : vector<8x8x8xf32>
    %cst = arith.constant dense<0.000000e+00> : vector<8x8xf32>
    %9 = vector.multi_reduction <add>, %8, %cst [1] : vector<8x8x8xf32> to vector<8x8xf32>
    %c0_6 = arith.constant 0 : index
    %c0_7 = arith.constant 0 : index
    %10 = vector.load %arg4[%c0_6, %c0_7] : memref<8x8xf32, #tpu.memory_space<vmem>>, vector<8x8xf32>
    tpu.vector_store %arg4[%c0_6, %c0_7], %9 {strides = array<i32>} : memref<8x8xf32, #tpu.memory_space<vmem>>, vector<8x8xf32>,
    %c0_8 = arith.constant 0 : index
    %c0_9 = arith.constant 0 : index
    %11 = vector.load %arg4[%c0_8, %c0_9] : memref<8x8xf32, #tpu.memory_space<vmem>>, vector<8x8xf32>
    %c1 = arith.constant 1 : index
    %c0_10 = arith.constant 0 : index
    %c0_11 = arith.constant 0 : index
    %c0_12 = arith.constant 0 : index
    %12 = vector.load %arg2[%c1, %c0_10, %c0_11, %c0_12] : memref<4x8x8x8xf32, #tpu.memory_space<vmem>>, vector<1x8x8x8xf32>
    %13 = vector.shape_cast %12 : vector<1x8x8x8xf32> to vector<8x8x8xf32>
    %14 = vector.shape_cast %11 : vector<8x8xf32> to vector<1x8x8xf32>
    %15 = vector.broadcast %14 : vector<1x8x8xf32> to vector<8x8x8xf32>
    %16 = arith.mulf %13, %15 : vector<8x8x8xf32>
    %cst_13 = arith.constant dense<0.000000e+00> : vector<8x8xf32>
    %17 = vector.multi_reduction <add>, %16, %cst_13 [1] : vector<8x8x8xf32> to vector<8x8xf32>
    %c0_14 = arith.constant 0 : index
    %c0_15 = arith.constant 0 : index
    %18 = vector.load %arg4[%c0_14, %c0_15] : memref<8x8xf32, #tpu.memory_space<vmem>>, vector<8x8xf32>
    tpu.vector_store %arg4[%c0_14, %c0_15], %17 {strides = array<i32>} : memref<8x8xf32, #tpu.memory_space<vmem>>, vector<8x8xf32>,
    %c0_16 = arith.constant 0 : index
    %c0_17 = arith.constant 0 : index
    %19 = vector.load %arg4[%c0_16, %c0_17] : memref<8x8xf32, #tpu.memory_space<vmem>>, vector<8x8xf32>
    %c2 = arith.constant 2 : index
    %c0_18 = arith.constant 0 : index
    %c0_19 = arith.constant 0 : index
    %c0_20 = arith.constant 0 : index
    %20 = vector.load %arg2[%c2, %c0_18, %c0_19, %c0_20] : memref<4x8x8x8xf32, #tpu.memory_space<vmem>>, vector<1x8x8x8xf32>
    %21 = vector.shape_cast %20 : vector<1x8x8x8xf32> to vector<8x8x8xf32>
    %22 = vector.shape_cast %19 : vector<8x8xf32> to vector<1x8x8xf32>
    %23 = vector.broadcast %22 : vector<1x8x8xf32> to vector<8x8x8xf32>
    %24 = arith.mulf %21, %23 : vector<8x8x8xf32>
    %cst_21 = arith.constant dense<0.000000e+00> : vector<8x8xf32>
    %25 = vector.multi_reduction <add>, %24, %cst_21 [1] : vector<8x8x8xf32> to vector<8x8xf32>
    %c0_22 = arith.constant 0 : index
    %c0_23 = arith.constant 0 : index
    %26 = vector.load %arg4[%c0_22, %c0_23] : memref<8x8xf32, #tpu.memory_space<vmem>>, vector<8x8xf32>
    tpu.vector_store %arg4[%c0_22, %c0_23], %25 {strides = array<i32>} : memref<8x8xf32, #tpu.memory_space<vmem>>, vector<8x8xf32>,
    %c0_24 = arith.constant 0 : index
    %c0_25 = arith.constant 0 : index
    %27 = vector.load %arg4[%c0_24, %c0_25] : memref<8x8xf32, #tpu.memory_space<vmem>>, vector<8x8xf32>
    %c3 = arith.constant 3 : index
    %c0_26 = arith.constant 0 : index
    %c0_27 = arith.constant 0 : index
    %c0_28 = arith.constant 0 : index
    %28 = vector.load %arg2[%c3, %c0_26, %c0_27, %c0_28] : memref<4x8x8x8xf32, #tpu.memory_space<vmem>>, vector<1x8x8x8xf32>
    %29 = vector.shape_cast %28 : vector<1x8x8x8xf32> to vector<8x8x8xf32>
    %30 = vector.shape_cast %27 : vector<8x8xf32> to vector<1x8x8xf32>
    %31 = vector.broadcast %30 : vector<1x8x8xf32> to vector<8x8x8xf32>
    %32 = arith.mulf %29, %31 : vector<8x8x8xf32>
    %cst_29 = arith.constant dense<0.000000e+00> : vector<8x8xf32>
    %33 = vector.multi_reduction <add>, %32, %cst_29 [1] : vector<8x8x8xf32> to vector<8x8xf32>
    %c0_30 = arith.constant 0 : index
    %c0_31 = arith.constant 0 : index
    %34 = vector.load %arg4[%c0_30, %c0_31] : memref<8x8xf32, #tpu.memory_space<vmem>>, vector<8x8xf32>
    tpu.vector_store %arg4[%c0_30, %c0_31], %33 {strides = array<i32>} : memref<8x8xf32, #tpu.memory_space<vmem>>, vector<8x8xf32>,
    %c0_i32_32 = arith.constant 0 : i32
    %35 = arith.cmpi eq, %arg0, %c0_i32_32 : i32
    %36 = arith.extui %35 : i1 to i32
    %c0_i32_33 = arith.constant 0 : i32
    %37 = arith.cmpi ne, %36, %c0_i32_33 : i32
    scf.if %37 {
      %c0_34 = arith.constant 0 : index
      %c0_35 = arith.constant 0 : index
      %38 = vector.load %arg4[%c0_34, %c0_35] : memref<8x8xf32, #tpu.memory_space<vmem>>, vector<8x8xf32>
      %c0_36 = arith.constant 0 : index
      %c0_37 = arith.constant 0 : index
      %39 = vector.load %arg3[%c0_36, %c0_37] : memref<8x8xf32, #tpu.memory_space<vmem>>, vector<8x8xf32>
      tpu.vector_store %arg3[%c0_36, %c0_37], %38 {strides = array<i32>} : memref<8x8xf32, #tpu.memory_space<vmem>>, vector<8x8xf32>,
    } else {
    }
    return
  }
  func.func @transform_0(%arg0: i32) -> (i32, i32) {
    %c0_i32 = arith.constant 0 : i32
    %c0_i32_0 = arith.constant 0 : i32
    %c0_i32_1 = arith.constant 0 : i32
    return %c0_i32, %c0_i32_0 : i32, i32
  }
  func.func @transform_1(%arg0: i32) -> (i32, i32, i32, i32) {
    %c0_i32 = arith.constant 0 : i32
    %c0_i32_0 = arith.constant 0 : i32
    %c0_i32_1 = arith.constant 0 : i32
    %c0_i32_2 = arith.constant 0 : i32
    return %arg0, %c0_i32, %c0_i32_0, %c0_i32_1 : i32, i32, i32, i32
  }
  func.func @transform_2(%arg0: i32) -> (i32, i32) {
    %c0_i32 = arith.constant 0 : i32
    %c0_i32_0 = arith.constant 0 : i32
    %c0_i32_1 = arith.constant 0 : i32
    return %c0_i32, %c0_i32_0 : i32, i32
  }
}

</mosaic_0001>

<bundles_post_ra>
// kernel: tpu_custom_call.1
= control target key start
LH: loop header
LB: loop body
LE: loop exit
PB: predicated region body
PF: predicated region fallthrough
CT: control target
= control target key end

     0   :  { %7 = vsyncpa [#allocation4], 0  ;;  %s643_s0 = inlined_call_operand.hbm [shape: f32[8,8], index: 0, kind: input, shape index: {}]   ;;  %s644_s1 = inlined_call_operand.hbm [shape: f32[4,8,8,8], index: 1, kind: input, shape index: {}]   ;;  %s645_s2 = inlined_call_operand.hbm [shape: f32[8,8], index: 2, kind: output, shape index: {}]  }
   0x1   :  { %8 = vsyncpa [#allocation7], 0 }
   0x2   :  { %9 = vsyncpa [#allocation5], 0  ;;  %s514_s9 = smov [#allocation3]   ;;  %s515_s11 = smov [#allocation6]  }
   0x3   :  { %s16_s10 = sshll.u32 %s514_s9, 4  ;;  %s25_s12 = sshll.u32 %s515_s11, 4  ;;  %s17_s10 = int_to_ptr.vmem [resolvable:$true] %s16_s10  ;;  %s534_s12 = int_to_ptr.vmem [resolvable:$true] %s25_s12 }
   0x4   :  { %s442_s15 = scalar_lea.hbm %s643_s0, 128 }
   0x5   :  { %p443_p0 = scmp.ne.s32.totalorder %s643_s0, %s442_s15  ;;  %p446_p1 = scmp.lt.u32.totalorder %s442_s15, %s643_s0 }
   0x7   :  { %p448_p2 = pnand %p446_p1, %p443_p0 }
   0x9   :  { %451 = shalt.err (!%p448_p2)
}
   0xa   :  { %s452_s20 = scalar_lea.vmem %s17_s10, 128  ;;  %p457_p4 = scmp.lt.s32.totalorder %s17_s10, %s17_s10 }
   0xb   :  { %p453_p3 = scmp.ne.s32.totalorder %s17_s10, %s452_s20  ;;  %p458_p5 = scmp.lt.s32.totalorder %s452_s20, %s452_s20 }
   0xd   :  { %p459_p6 = por %p458_p5, %p457_p4 }
   0xf   :  { %p460_p7 = pnand %p459_p6, %p453_p3 }
  0x11   :  { %463 = shalt.err (!%p460_p7)
}
  0x12   :  { %19 = dma.hbm_to_vmem [thread:$0]  %s643_s0, 128, %s17_s10, [#allocation4]  }
  0x13   :  { %s464_s25 = scalar_lea.hbm %s644_s1, 4096 }
  0x14   :  { %p465_p8 = scmp.ne.s32.totalorder %s644_s1, %s464_s25  ;;  %p468_p9 = scmp.lt.u32.totalorder %s464_s25, %s644_s1 }
  0x16   :  { %p470_p10 = pnand %p468_p9, %p465_p8 }
  0x18   :  { %473 = shalt.err (!%p470_p10)
}
  0x19   :  { %s474_s30 = scalar_lea.vmem %s534_s12, 4096  ;;  %p479_p12 = scmp.lt.s32.totalorder %s534_s12, %s534_s12 }
  0x1a   :  { %p475_p11 = scmp.ne.s32.totalorder %s534_s12, %s474_s30  ;;  %p480_p13 = scmp.lt.s32.totalorder %s474_s30, %s474_s30 }
  0x1c   :  { %p481_p0 = por %p480_p13, %p479_p12 }
  0x1e   :  { %p482_p1 = pnand %p481_p0, %p475_p11 }
  0x20   :  { %485 = shalt.err (!%p482_p1)
}
  0x21   :  { %s516_s0 = smov 128   ;;  %s517_s3 = smov 8  }
  0x22   :  { %31 = dma.hbm_to_vmem [thread:$0]  %s644_s1, 4096, %s534_s12, [#allocation7], %s516_s0, %s516_s0, %s517_s3  }
  0x23   :  { %508 = dma.done.wait [#allocation4], 128  }
  0x24   :  { %509 = vsyncadd [#allocation4], 4294967168 }
  0x25   :  { %510 = dma.done.wait [#allocation7], 4096  }
  0x26   :  { %511 = vsyncadd [#allocation7], 4294963200  ;;  %vm43_vm0 = vcmask 64512   ;;  %v42_v0 = vld [vmem:[#allocation3] sm:$0xff]  ;;  %v46_v1 = vld [vmem:[#allocation6] sm:$0xff]  ;;  %vm127_vm1 = vcmask 1041409  }
  0x27   :  { %44 = vst.msk [vmem:[#allocation2] sm:$0xff] %vm43_vm0, %v42_v0  ;;  %v47_v2 = vld [vmem:[#allocation6 + $0x8] sm:$0xff]  ;;  %v48_v3 = vld [vmem:[#allocation6 + $0x10] sm:$0xff]  ;;  %v49_v4 = vld [vmem:[#allocation6 + $0x18] sm:$0xff]  ;;  %vm129_vm2 = vcmask 1042434   ;;  %vm131_vm3 = vcmask 1043459  }
  0x28   :  { %v50_v5 = vld [vmem:[#allocation6 + $0x20] sm:$0xff]  ;;  %v51_v6 = vld [vmem:[#allocation6 + $0x28] sm:$0xff]  ;;  %v52_v7 = vld [vmem:[#allocation6 + $0x30] sm:$0xff]  ;;  %vm133_vm4 = vcmask 1044484   ;;  %vm135_vm5 = vcmask 1045509   ;;  %vm137_vm6 = vcmask 1046534  }
  0x29   :  { %v53_v8 = vld [vmem:[#allocation6 + $0x38] sm:$0xff]  ;;  %vm139_vm7 = vcmask 1047559   ;;  %s518_s1 = smov [#allocation8]  }
  0x2a   :  { %s427_s6 = sshll.u32 %s518_s1, 4  ;;  %s428_s6 = int_to_ptr.vmem [resolvable:$true] %s427_s6 }
  0x2b   :  { %s486_s7 = scalar_lea.vmem %s428_s6, 128  ;;  %p491_p3 = scmp.lt.s32.totalorder %s428_s6, %s428_s6 }
  0x2c   :  { %p487_p2 = scmp.ne.s32.totalorder %s428_s6, %s486_s7  ;;  %p492_p4 = scmp.lt.s32.totalorder %s486_s7, %s486_s7 }
  0x2e   :  { %v45_v9 = vld [vmem:[#allocation2] sm:$0xff]  ;;  %p493_p5 = por %p492_p4, %p491_p3 }
  0x2f   :  { %v54_v10 = vmul.f32 %v46_v1, %v45_v9  ;;  %v55_v11 = vmul.f32 %v47_v2, %v45_v9  ;;  %v56_v12 = vmul.f32 %v48_v3, %v45_v9  ;;  %v57_v13 = vmul.f32 %v49_v4, %v45_v9 }
  0x30   :  { %v58_v14 = vmul.f32 %v50_v5, %v45_v9  ;;  %v59_v15 = vmul.f32 %v51_v6, %v45_v9  ;;  %v60_v16 = vmul.f32 %v52_v7, %v45_v9  ;;  %v61_v17 = vmul.f32 %v53_v8, %v45_v9  ;;  %p494_p6 = pnand %p493_p5, %p487_p2 }
  0x31   :  { %v63_v18 = vsel %vm43_vm0, %v54_v10, 0.0  ;;  %v70_v19 = vsel %vm43_vm0, %v55_v11, 0.0  ;;  %v77_v20 = vsel %vm43_vm0, %v56_v12, 0.0  ;;  %v84_v21 = vsel %vm43_vm0, %v57_v13, 0.0 }
  0x32   :  { %v64_v22 = vrot.slane %v63_v18, 4  ;;  %v71_v23 = vrot.slane %v70_v19, 4  ;;  %v78_v24 = vrot.slane %v77_v20, 4  ;;  %v85_v25 = vrot.slane %v84_v21, 4 }
  0x33   :  { %v91_v26 = vsel %vm43_vm0, %v58_v14, 0.0  ;;  %v98_v27 = vsel %vm43_vm0, %v59_v15, 0.0  ;;  %v105_v28 = vsel %vm43_vm0, %v60_v16, 0.0  ;;  %v112_v29 = vsel %vm43_vm0, %v61_v17, 0.0  ;;  %v145_v17 = vld [vmem:[#allocation6 + $0x40] sm:$0xff] }
  0x34   :  { %v65_v30 = vadd.f32 %v64_v22, %v63_v18  ;;  %v72_v31 = vadd.f32 %v71_v23, %v70_v19  ;;  %v79_v32 = vadd.f32 %v78_v24, %v77_v20  ;;  %v86_v33 = vadd.f32 %v85_v25, %v84_v21  ;;  %v146_v18 = vld [vmem:[#allocation6 + $0x48] sm:$0xff]  ;;  %v147_v19 = vld [vmem:[#allocation6 + $0x50] sm:$0xff]  ;;  %v148_v20 = vld [vmem:[#allocation6 + $0x58] sm:$0xff] }
  0x35   :  { %v92_v34 = vrot.slane %v91_v26, 4  ;;  %v99_v35 = vrot.slane %v98_v27, 4  ;;  %v106_v36 = vrot.slane %v105_v28, 4  ;;  %v113_v37 = vrot.slane %v112_v29, 4  ;;  %v149_v21 = vld [vmem:[#allocation6 + $0x60] sm:$0xff]  ;;  %v150_v22 = vld [vmem:[#allocation6 + $0x68] sm:$0xff] }
  0x36   :  { %v66_v38 = vrot.slane %v65_v30, 2  ;;  %v73_v39 = vrot.slane %v72_v31, 2  ;;  %v80_v40 = vrot.slane %v79_v32, 2  ;;  %v87_v41 = vrot.slane %v86_v33, 2  ;;  %v151_v23 = vld [vmem:[#allocation6 + $0x70] sm:$0xff]  ;;  %v152_v24 = vld [vmem:[#allocation6 + $0x78] sm:$0xff] }
  0x37   :  { %v93_v42 = vadd.f32 %v92_v34, %v91_v26  ;;  %v100_v43 = vadd.f32 %v99_v35, %v98_v27  ;;  %v107_v44 = vadd.f32 %v106_v36, %v105_v28  ;;  %v114_v45 = vadd.f32 %v113_v37, %v112_v29 }
  0x38   :  { %v67_v46 = vadd.f32 %v66_v38, %v65_v30  ;;  %v74_v47 = vadd.f32 %v73_v39, %v72_v31  ;;  %v81_v48 = vadd.f32 %v80_v40, %v79_v32  ;;  %v88_v49 = vadd.f32 %v87_v41, %v86_v33 }
  0x39   :  { %v94_v50 = vrot.slane %v93_v42, 2  ;;  %v101_v51 = vrot.slane %v100_v43, 2  ;;  %v108_v52 = vrot.slane %v107_v44, 2  ;;  %v115_v53 = vrot.slane %v114_v45, 2 }
  0x3a   :  { %v68_v54 = vrot.slane %v67_v46, 1  ;;  %v75_v55 = vrot.slane %v74_v47, 1  ;;  %v82_v56 = vrot.slane %v81_v48, 1  ;;  %v89_v57 = vrot.slane %v88_v49, 1 }
  0x3b   :  { %v95_v58 = vadd.f32 %v94_v50, %v93_v42  ;;  %v102_v59 = vadd.f32 %v101_v51, %v100_v43  ;;  %v109_v60 = vadd.f32 %v108_v52, %v107_v44  ;;  %v116_v61 = vadd.f32 %v115_v53, %v114_v45 }
  0x3c   :  { %v69_v62 = vadd.f32 %v68_v54, %v67_v46  ;;  %v76_v63 = vadd.f32 %v75_v55, %v74_v47  ;;  %v83_v0 = vadd.f32 %v82_v56, %v81_v48  ;;  %v90_v5 = vadd.f32 %v89_v57, %v88_v49 }
  0x3d   :  { %v96_v1 = vrot.slane %v95_v58, 1  ;;  %v103_v2 = vrot.slane %v102_v59, 1  ;;  %v110_v3 = vrot.slane %v109_v60, 1  ;;  %v117_v6 = vrot.slane %v116_v61, 1 }
  0x3e   :  { %v128_v4 = vsel %vm127_vm1, %v76_v63, %v69_v62 }
  0x3f   :  { %v97_v7 = vadd.f32 %v96_v1, %v95_v58  ;;  %v130_v8 = vsel %vm129_vm2, %v83_v0, %v128_v4  ;;  %v104_v9 = vadd.f32 %v103_v2, %v102_v59  ;;  %v111_v11 = vadd.f32 %v110_v3, %v109_v60 }
  0x40   :  { %v132_v10 = vsel %vm131_vm3, %v90_v5, %v130_v8  ;;  %v118_v13 = vadd.f32 %v117_v6, %v116_v61 }
  0x41   :  { %v134_v12 = vsel %vm133_vm4, %v97_v7, %v132_v10 }
  0x42   :  { %v136_v14 = vsel %vm135_vm5, %v104_v9, %v134_v12 }
  0x43   :  { %v138_v15 = vsel %vm137_vm6, %v111_v11, %v136_v14 }
  0x44   :  { %v140_v16 = vsel %vm139_vm7, %v118_v13, %v138_v15 }
  0x45   :  { %142 = vst.msk [vmem:[#allocation2] sm:$0xff] %vm43_vm0, %v140_v16 }
  0x4c   :  { %v143_v25 = vld [vmem:[#allocation2] sm:$0xff] }
  0x4d   :  { %v153_v26 = vmul.f32 %v145_v17, %v143_v25  ;;  %v154_v27 = vmul.f32 %v146_v18, %v143_v25  ;;  %v155_v28 = vmul.f32 %v147_v19, %v143_v25  ;;  %v156_v29 = vmul.f32 %v148_v20, %v143_v25 }
  0x4e   :  { %v157_v30 = vmul.f32 %v149_v21, %v143_v25  ;;  %v158_v31 = vmul.f32 %v150_v22, %v143_v25  ;;  %v159_v32 = vmul.f32 %v151_v23, %v143_v25  ;;  %v160_v33 = vmul.f32 %v152_v24, %v143_v25 }
  0x4f   :  { %v161_v34 = vsel %vm43_vm0, %v153_v26, 0.0  ;;  %v168_v35 = vsel %vm43_vm0, %v154_v27, 0.0  ;;  %v175_v36 = vsel %vm43_vm0, %v155_v28, 0.0  ;;  %v182_v37 = vsel %vm43_vm0, %v156_v29, 0.0 }
  0x50   :  { %v162_v38 = vrot.slane %v161_v34, 4  ;;  %v169_v39 = vrot.slane %v168_v35, 4  ;;  %v176_v40 = vrot.slane %v175_v36, 4  ;;  %v183_v41 = vrot.slane %v182_v37, 4 }
  0x51   :  { %v189_v42 = vsel %vm43_vm0, %v157_v30, 0.0  ;;  %v196_v43 = vsel %vm43_vm0, %v158_v31, 0.0  ;;  %v203_v44 = vsel %vm43_vm0, %v159_v32, 0.0  ;;  %v210_v45 = vsel %vm43_vm0, %v160_v33, 0.0  ;;  %v236_v33 = vld [vmem:[#allocation6 + $0x80] sm:$0xff] }
  0x52   :  { %v163_v46 = vadd.f32 %v162_v38, %v161_v34  ;;  %v170_v47 = vadd.f32 %v169_v39, %v168_v35  ;;  %v177_v48 = vadd.f32 %v176_v40, %v175_v36  ;;  %v184_v49 = vadd.f32 %v183_v41, %v182_v37  ;;  %v237_v34 = vld [vmem:[#allocation6 + $0x88] sm:$0xff]  ;;  %v238_v35 = vld [vmem:[#allocation6 + $0x90] sm:$0xff]  ;;  %v239_v36 = vld [vmem:[#allocation6 + $0x98] sm:$0xff] }
  0x53   :  { %v190_v50 = vrot.slane %v189_v42, 4  ;;  %v197_v51 = vrot.slane %v196_v43, 4  ;;  %v204_v52 = vrot.slane %v203_v44, 4  ;;  %v211_v53 = vrot.slane %v210_v45, 4  ;;  %v240_v37 = vld [vmem:[#allocation6 + $0xa0] sm:$0xff]  ;;  %v241_v38 = vld [vmem:[#allocation6 + $0xa8] sm:$0xff] }
  0x54   :  { %v164_v54 = vrot.slane %v163_v46, 2  ;;  %v171_v55 = vrot.slane %v170_v47, 2  ;;  %v178_v56 = vrot.slane %v177_v48, 2  ;;  %v185_v57 = vrot.slane %v184_v49, 2  ;;  %v242_v39 = vld [vmem:[#allocation6 + $0xb0] sm:$0xff]  ;;  %v243_v40 = vld [vmem:[#allocation6 + $0xb8] sm:$0xff] }
  0x55   :  { %v191_v58 = vadd.f32 %v190_v50, %v189_v42  ;;  %v198_v59 = vadd.f32 %v197_v51, %v196_v43  ;;  %v205_v60 = vadd.f32 %v204_v52, %v203_v44  ;;  %v212_v61 = vadd.f32 %v211_v53, %v210_v45 }
  0x56   :  { %v165_v62 = vadd.f32 %v164_v54, %v163_v46  ;;  %v172_v63 = vadd.f32 %v171_v55, %v170_v47  ;;  %v179_v0 = vadd.f32 %v178_v56, %v177_v48  ;;  %v186_v1 = vadd.f32 %v185_v57, %v184_v49 }
  0x57   :  { %v192_v2 = vrot.slane %v191_v58, 2  ;;  %v199_v3 = vrot.slane %v198_v59, 2  ;;  %v206_v4 = vrot.slane %v205_v60, 2  ;;  %v213_v5 = vrot.slane %v212_v61, 2 }
  0x58   :  { %v166_v6 = vrot.slane %v165_v62, 1  ;;  %v173_v7 = vrot.slane %v172_v63, 1  ;;  %v180_v8 = vrot.slane %v179_v0, 1  ;;  %v187_v9 = vrot.slane %v186_v1, 1 }
  0x59   :  { %v193_v10 = vadd.f32 %v192_v2, %v191_v58  ;;  %v200_v11 = vadd.f32 %v199_v3, %v198_v59  ;;  %v207_v12 = vadd.f32 %v206_v4, %v205_v60  ;;  %v214_v13 = vadd.f32 %v213_v5, %v212_v61 }
  0x5a   :  { %v167_v14 = vadd.f32 %v166_v6, %v165_v62  ;;  %v174_v15 = vadd.f32 %v173_v7, %v172_v63  ;;  %v181_v16 = vadd.f32 %v180_v8, %v179_v0  ;;  %v188_v21 = vadd.f32 %v187_v9, %v186_v1 }
  0x5b   :  { %v194_v17 = vrot.slane %v193_v10, 1  ;;  %v201_v18 = vrot.slane %v200_v11, 1  ;;  %v208_v19 = vrot.slane %v207_v12, 1  ;;  %v215_v22 = vrot.slane %v214_v13, 1 }
  0x5c   :  { %v225_v20 = vsel %vm127_vm1, %v174_v15, %v167_v14 }
  0x5d   :  { %v195_v23 = vadd.f32 %v194_v17, %v193_v10  ;;  %v226_v24 = vsel %vm129_vm2, %v181_v16, %v225_v20  ;;  %v202_v25 = vadd.f32 %v201_v18, %v200_v11  ;;  %v209_v27 = vadd.f32 %v208_v19, %v207_v12 }
  0x5e   :  { %v227_v26 = vsel %vm131_vm3, %v188_v21, %v226_v24  ;;  %v216_v29 = vadd.f32 %v215_v22, %v214_v13 }
  0x5f   :  { %v228_v28 = vsel %vm133_vm4, %v195_v23, %v227_v26 }
  0x60   :  { %v229_v30 = vsel %vm135_vm5, %v202_v25, %v228_v28 }
  0x61   :  { %v230_v31 = vsel %vm137_vm6, %v209_v27, %v229_v30 }
  0x62   :  { %v231_v32 = vsel %vm139_vm7, %v216_v29, %v230_v31 }
  0x63   :  { %233 = vst.msk [vmem:[#allocation2] sm:$0xff] %vm43_vm0, %v231_v32 }
  0x6a   :  { %v234_v41 = vld [vmem:[#allocation2] sm:$0xff] }
  0x6b   :  { %v244_v42 = vmul.f32 %v236_v33, %v234_v41  ;;  %v245_v43 = vmul.f32 %v237_v34, %v234_v41  ;;  %v246_v44 = vmul.f32 %v238_v35, %v234_v41  ;;  %v247_v45 = vmul.f32 %v239_v36, %v234_v41 }
  0x6c   :  { %v248_v46 = vmul.f32 %v240_v37, %v234_v41  ;;  %v249_v47 = vmul.f32 %v241_v38, %v234_v41  ;;  %v250_v48 = vmul.f32 %v242_v39, %v234_v41  ;;  %v251_v49 = vmul.f32 %v243_v40, %v234_v41 }
  0x6d   :  { %v252_v50 = vsel %vm43_vm0, %v244_v42, 0.0  ;;  %v259_v51 = vsel %vm43_vm0, %v245_v43, 0.0  ;;  %v266_v52 = vsel %vm43_vm0, %v246_v44, 0.0  ;;  %v273_v53 = vsel %vm43_vm0, %v247_v45, 0.0 }
  0x6e   :  { %v253_v54 = vrot.slane %v252_v50, 4  ;;  %v260_v55 = vrot.slane %v259_v51, 4  ;;  %v267_v56 = vrot.slane %v266_v52, 4  ;;  %v274_v57 = vrot.slane %v273_v53, 4 }
  0x6f   :  { %v280_v58 = vsel %vm43_vm0, %v248_v46, 0.0  ;;  %v287_v59 = vsel %vm43_vm0, %v249_v47, 0.0  ;;  %v294_v60 = vsel %vm43_vm0, %v250_v48, 0.0  ;;  %v301_v61 = vsel %vm43_vm0, %v251_v49, 0.0  ;;  %v327_v49 = vld [vmem:[#allocation6 + $0xc0] sm:$0xff] }
  0x70   :  { %v254_v62 = vadd.f32 %v253_v54, %v252_v50  ;;  %v261_v63 = vadd.f32 %v260_v55, %v259_v51  ;;  %v268_v0 = vadd.f32 %v267_v56, %v266_v52  ;;  %v275_v1 = vadd.f32 %v274_v57, %v273_v53  ;;  %v328_v50 = vld [vmem:[#allocation6 + $0xc8] sm:$0xff]  ;;  %v329_v51 = vld [vmem:[#allocation6 + $0xd0] sm:$0xff]  ;;  %v330_v52 = vld [vmem:[#allocation6 + $0xd8] sm:$0xff] }
  0x71   :  { %v281_v2 = vrot.slane %v280_v58, 4  ;;  %v288_v3 = vrot.slane %v287_v59, 4  ;;  %v295_v4 = vrot.slane %v294_v60, 4  ;;  %v302_v5 = vrot.slane %v301_v61, 4  ;;  %v331_v53 = vld [vmem:[#allocation6 + $0xe0] sm:$0xff]  ;;  %v332_v54 = vld [vmem:[#allocation6 + $0xe8] sm:$0xff] }
  0x72   :  { %v255_v6 = vrot.slane %v254_v62, 2  ;;  %v262_v7 = vrot.slane %v261_v63, 2  ;;  %v269_v8 = vrot.slane %v268_v0, 2  ;;  %v276_v9 = vrot.slane %v275_v1, 2  ;;  %v333_v55 = vld [vmem:[#allocation6 + $0xf0] sm:$0xff]  ;;  %v334_v56 = vld [vmem:[#allocation6 + $0xf8] sm:$0xff] }
  0x73   :  { %v282_v10 = vadd.f32 %v281_v2, %v280_v58  ;;  %v289_v11 = vadd.f32 %v288_v3, %v287_v59  ;;  %v296_v12 = vadd.f32 %v295_v4, %v294_v60  ;;  %v303_v13 = vadd.f32 %v302_v5, %v301_v61 }
  0x74   :  { %v256_v14 = vadd.f32 %v255_v6, %v254_v62  ;;  %v263_v15 = vadd.f32 %v262_v7, %v261_v63  ;;  %v270_v16 = vadd.f32 %v269_v8, %v268_v0  ;;  %v277_v17 = vadd.f32 %v276_v9, %v275_v1 }
  0x75   :  { %v283_v18 = vrot.slane %v282_v10, 2  ;;  %v290_v19 = vrot.slane %v289_v11, 2  ;;  %v297_v20 = vrot.slane %v296_v12, 2  ;;  %v304_v21 = vrot.slane %v303_v13, 2 }
  0x76   :  { %v257_v22 = vrot.slane %v256_v14, 1  ;;  %v264_v23 = vrot.slane %v263_v15, 1  ;;  %v271_v24 = vrot.slane %v270_v16, 1  ;;  %v278_v25 = vrot.slane %v277_v17, 1 }
  0x77   :  { %v284_v26 = vadd.f32 %v283_v18, %v282_v10  ;;  %v291_v27 = vadd.f32 %v290_v19, %v289_v11  ;;  %v298_v28 = vadd.f32 %v297_v20, %v296_v12  ;;  %v305_v29 = vadd.f32 %v304_v21, %v303_v13 }
  0x78   :  { %v258_v30 = vadd.f32 %v257_v22, %v256_v14  ;;  %v265_v31 = vadd.f32 %v264_v23, %v263_v15  ;;  %v272_v32 = vadd.f32 %v271_v24, %v270_v16  ;;  %v279_v37 = vadd.f32 %v278_v25, %v277_v17 }
  0x79   :  { %v285_v33 = vrot.slane %v284_v26, 1  ;;  %v292_v34 = vrot.slane %v291_v27, 1  ;;  %v299_v35 = vrot.slane %v298_v28, 1  ;;  %v306_v38 = vrot.slane %v305_v29, 1 }
  0x7a   :  { %v316_v36 = vsel %vm127_vm1, %v265_v31, %v258_v30 }
  0x7b   :  { %v286_v39 = vadd.f32 %v285_v33, %v284_v26  ;;  %v317_v40 = vsel %vm129_vm2, %v272_v32, %v316_v36  ;;  %v293_v41 = vadd.f32 %v292_v34, %v291_v27  ;;  %v300_v43 = vadd.f32 %v299_v35, %v298_v28 }
  0x7c   :  { %v318_v42 = vsel %vm131_vm3, %v279_v37, %v317_v40  ;;  %v307_v45 = vadd.f32 %v306_v38, %v305_v29 }
  0x7d   :  { %v319_v44 = vsel %vm133_vm4, %v286_v39, %v318_v42 }
  0x7e   :  { %v320_v46 = vsel %vm135_vm5, %v293_v41, %v319_v44 }
  0x7f   :  { %v321_v47 = vsel %vm137_vm6, %v300_v43, %v320_v46 }
  0x80   :  { %v322_v48 = vsel %vm139_vm7, %v307_v45, %v321_v47 }
  0x81   :  { %324 = vst.msk [vmem:[#allocation2] sm:$0xff] %vm43_vm0, %v322_v48 }
  0x88   :  { %v325_v57 = vld [vmem:[#allocation2] sm:$0xff] }
  0x89   :  { %v335_v58 = vmul.f32 %v327_v49, %v325_v57  ;;  %v336_v59 = vmul.f32 %v328_v50, %v325_v57  ;;  %v337_v60 = vmul.f32 %v329_v51, %v325_v57  ;;  %v338_v61 = vmul.f32 %v330_v52, %v325_v57 }
  0x8a   :  { %v339_v62 = vmul.f32 %v331_v53, %v325_v57  ;;  %v340_v63 = vmul.f32 %v332_v54, %v325_v57  ;;  %v341_v0 = vmul.f32 %v333_v55, %v325_v57  ;;  %v342_v1 = vmul.f32 %v334_v56, %v325_v57 }
  0x8b   :  { %v343_v2 = vsel %vm43_vm0, %v335_v58, 0.0  ;;  %v350_v3 = vsel %vm43_vm0, %v336_v59, 0.0  ;;  %v357_v4 = vsel %vm43_vm0, %v337_v60, 0.0  ;;  %v364_v5 = vsel %vm43_vm0, %v338_v61, 0.0 }
  0x8c   :  { %v344_v6 = vrot.slane %v343_v2, 4  ;;  %v351_v7 = vrot.slane %v350_v3, 4  ;;  %v358_v8 = vrot.slane %v357_v4, 4  ;;  %v365_v9 = vrot.slane %v364_v5, 4 }
  0x8d   :  { %v371_v10 = vsel %vm43_vm0, %v339_v62, 0.0  ;;  %v378_v11 = vsel %vm43_vm0, %v340_v63, 0.0  ;;  %v385_v12 = vsel %vm43_vm0, %v341_v0, 0.0  ;;  %v392_v13 = vsel %vm43_vm0, %v342_v1, 0.0 }
  0x8e   :  { %v345_v14 = vadd.f32 %v344_v6, %v343_v2  ;;  %v352_v15 = vadd.f32 %v351_v7, %v350_v3  ;;  %v359_v16 = vadd.f32 %v358_v8, %v357_v4  ;;  %v366_v17 = vadd.f32 %v365_v9, %v364_v5 }
  0x8f   :  { %v372_v18 = vrot.slane %v371_v10, 4  ;;  %v379_v19 = vrot.slane %v378_v11, 4  ;;  %v386_v20 = vrot.slane %v385_v12, 4  ;;  %v393_v21 = vrot.slane %v392_v13, 4 }
  0x90   :  { %v346_v22 = vrot.slane %v345_v14, 2  ;;  %v353_v23 = vrot.slane %v352_v15, 2  ;;  %v360_v24 = vrot.slane %v359_v16, 2  ;;  %v367_v25 = vrot.slane %v366_v17, 2 }
  0x91   :  { %v373_v26 = vadd.f32 %v372_v18, %v371_v10  ;;  %v380_v27 = vadd.f32 %v379_v19, %v378_v11  ;;  %v387_v28 = vadd.f32 %v386_v20, %v385_v12  ;;  %v394_v29 = vadd.f32 %v393_v21, %v392_v13 }
  0x92   :  { %v347_v30 = vadd.f32 %v346_v22, %v345_v14  ;;  %v354_v31 = vadd.f32 %v353_v23, %v352_v15  ;;  %v361_v32 = vadd.f32 %v360_v24, %v359_v16  ;;  %v368_v33 = vadd.f32 %v367_v25, %v366_v17 }
  0x93   :  { %v374_v34 = vrot.slane %v373_v26, 2  ;;  %v381_v35 = vrot.slane %v380_v27, 2  ;;  %v388_v36 = vrot.slane %v387_v28, 2  ;;  %v395_v37 = vrot.slane %v394_v29, 2 }
  0x94   :  { %v348_v38 = vrot.slane %v347_v30, 1  ;;  %v355_v39 = vrot.slane %v354_v31, 1  ;;  %v362_v40 = vrot.slane %v361_v32, 1  ;;  %v369_v41 = vrot.slane %v368_v33, 1 }
  0x95   :  { %v375_v42 = vadd.f32 %v374_v34, %v373_v26  ;;  %v382_v43 = vadd.f32 %v381_v35, %v380_v27  ;;  %v389_v44 = vadd.f32 %v388_v36, %v387_v28  ;;  %v396_v45 = vadd.f32 %v395_v37, %v394_v29 }
  0x96   :  { %v349_v46 = vadd.f32 %v348_v38, %v347_v30  ;;  %v356_v47 = vadd.f32 %v355_v39, %v354_v31  ;;  %v363_v48 = vadd.f32 %v362_v40, %v361_v32  ;;  %v370_v53 = vadd.f32 %v369_v41, %v368_v33 }
  0x97   :  { %v376_v49 = vrot.slane %v375_v42, 1  ;;  %v383_v50 = vrot.slane %v382_v43, 1  ;;  %v390_v51 = vrot.slane %v389_v44, 1  ;;  %v397_v54 = vrot.slane %v396_v45, 1 }
  0x98   :  { %v407_v52 = vsel %vm127_vm1, %v356_v47, %v349_v46 }
  0x99   :  { %v377_v55 = vadd.f32 %v376_v49, %v375_v42  ;;  %v408_v56 = vsel %vm129_vm2, %v363_v48, %v407_v52  ;;  %v384_v57 = vadd.f32 %v383_v50, %v382_v43  ;;  %v391_v59 = vadd.f32 %v390_v51, %v389_v44 }
  0x9a   :  { %v409_v58 = vsel %vm131_vm3, %v370_v53, %v408_v56  ;;  %v398_v61 = vadd.f32 %v397_v54, %v396_v45 }
  0x9b   :  { %v410_v60 = vsel %vm133_vm4, %v377_v55, %v409_v58 }
  0x9c   :  { %v411_v62 = vsel %vm135_vm5, %v384_v57, %v410_v60 }
  0x9d   :  { %v412_v63 = vsel %vm137_vm6, %v391_v59, %v411_v62 }
  0x9e   :  { %v413_v0 = vsel %vm139_vm7, %v398_v61, %v412_v63 }
  0x9f   :  { %415 = vst.msk [vmem:[#allocation2] sm:$0xff] %vm43_vm0, %v413_v0 }
  0xa6   :  { %v419_v1 = vld [vmem:[#allocation2] sm:$0xff] }
  0xa7   :  { %420 = vst.msk [vmem:[#allocation8] sm:$0xff] %vm43_vm0, %v419_v1 }
  0xa8   :  { %497 = shalt.err (!%p494_p6)
}
  0xa9   :  { %s498_s10 = scalar_lea.hbm %s645_s2, 128 }
  0xaa   :  { %p499_p7 = scmp.ne.s32.totalorder %s645_s2, %s498_s10  ;;  %p502_p8 = scmp.lt.u32.totalorder %s498_s10, %s645_s2 }
  0xac   :  { %p504_p9 = pnand %p502_p8, %p499_p7 }
  0xae   :  { %507 = shalt.err (!%p504_p9)
}
  0xaf   :  { %430 = dma.vmem_to_hbm [thread:$0]  %s428_s6, 128, %s645_s2, [#allocation5]  }
  0xb0   :  { %512 = dma.done.wait [#allocation5], 128  }
  0xb1   :  { %513 = vsyncadd [#allocation5], 4294967168 }
  0xb2   :  { %434 = vsyncpa [#allocation4], 1 }
  0xb3   :  { %435 = vsyncpa [#allocation7], 1 }
  0xb4   :  { %436 = vsyncpa [#allocation5], 1 }

</bundles_post_ra>
